<compile_context>
chip_gen: v5e
topology: v5e:2x2
jax: 0.10.0
libtpu: 0.0.40
codegen_flags: <defaults>
</compile_context>

<pallas_src>
import jax
import jax.numpy as jnp
from jax.experimental import pallas as pl
from jax.experimental.pallas import tpu as pltpu

EPS = 1e-8


def _make_dain_kernel(time_axis):
    """Build the fused DAIN kernel.

    time_axis == 2 -> blocks are (TB, D, T)  (long-T, T on lanes)
    time_axis == 1 -> blocks are (TB, T, D)  (short-T, D on lanes)
    """

    def kernel(x_ref, wmT_ref, wsT_ref, wgT_ref, bg_ref, o_ref):
        x = x_ref[...]                                   # slab in input dtype
        inv_t = 1.0 / x.shape[time_axis]

        # ---- pass 1: per-(batch, feature) time mean + adaptive mean (MXU) ----
        avg = jnp.sum(x, axis=time_axis, dtype=jnp.float32) * inv_t   # (TB, D)
        a = jnp.dot(avg, wmT_ref[...], preferred_element_type=jnp.float32)
        a_b = jnp.expand_dims(a, time_axis)              # broadcast over time

        # ---- pass 2: second moment of the centered slab + adaptive scale ----
        d = x - a_b                                      # f32 (promoted), local
        std = jnp.sqrt(
            jnp.sum(d * d, axis=time_axis, dtype=jnp.float32) * inv_t + EPS)
        s = jnp.dot(std, wsT_ref[...], preferred_element_type=jnp.float32)
        s = jnp.where(s <= EPS, 1.0, s)
        inv_s = 1.0 / s                                  # exact, tiny (TB, D)

        # ---- gating: mean of the normalized slab, computed analytically ----
        avg2 = (avg - a) * inv_s
        gate = jax.nn.sigmoid(
            jnp.dot(avg2, wgT_ref[...], preferred_element_type=jnp.float32)
            + bg_ref[...])
        m_b = jnp.expand_dims(gate * inv_s, time_axis)   # gate / adaptive_std

        # ---- single fused write; recompute the subtract instead of keeping
        # a centered (TB, D, T) temp live across the whole kernel ----
        o_ref[...] = ((x - a_b) * m_b).astype(o_ref.dtype)

    return kernel


def _tpu_vmem_capacity_bytes():
    # Conservative fallback = smallest per-core VMEM across v5e/v6e/v7x.
    cap = 64 << 20
    try:
        info = pltpu.get_tpu_info()
        cap = int(getattr(info, "vmem_capacity_bytes", cap) or cap)
    except Exception:
        pass
    return cap


def _num_tensorcores():
    # Only v7x has 2 TensorCores per chip among the targeted generations.
    try:
        kind = jax.devices()[0].device_kind.lower()
        if "v7" in kind:
            return 2
    except Exception:
        pass
    return 1


def _choose_tb(B, slab_bytes, budget_bytes, num_tc):
    """Largest divisor of B whose pipelined working set fits the VMEM budget.

    Working set ~= 6 slabs: in/out double-buffered (4x) + ~2 slabs of temps.
    On multi-TC chips prefer a grid that is a multiple of the TC count so the
    'parallel' batch axis stays load-balanced; on single-TC chips just take
    the biggest block.
    """
    cap = max(1, budget_bytes // (6 * max(slab_bytes, 1)))
    cands = [tb for tb in range(1, B + 1) if B % tb == 0 and tb <= cap]
    if not cands:
        # TODO(synk): two-pass (stats + normalize) split for very long T.
        return 1
    if num_tc >= 2 and B >= num_tc:
        balanced = [tb for tb in cands if (B // tb) % num_tc == 0]
        if balanced:
            return max(balanced)
        multi = [tb for tb in cands if (B // tb) >= num_tc]
        if multi:
            return max(multi)
    return max(cands)


def dain_full_pallas(x, w_mean, w_scale, w_gate, b_gate):
    """x: (B, D, T); weights: (D, D) [out, in] as in nn.Linear; b_gate: (D,)."""
    B, D, T = x.shape

    # Pre-transpose weights host-side so the kernel does y = s @ W^T directly.
    wmT = jnp.asarray(w_mean).T
    wsT = jnp.asarray(w_scale).T
    wgT = jnp.asarray(w_gate).T
    bg_row = jnp.asarray(b_gate).reshape(1, D)

    # Lane-dense layout: for short sequences put D (the larger axis) on lanes.
    transpose = (T < 128) and (D > T)
    xk = jnp.transpose(x, (0, 2, 1)) if transpose else x
    time_axis = 1 if transpose else 2
    block_of = (lambda tb: (tb, T, D)) if transpose else (lambda tb: (tb, D, T))

    itemsize = jnp.dtype(x.dtype).itemsize
    slab_bytes = D * T * max(itemsize, 4)      # temps / accumulation are f32

    cap = _tpu_vmem_capacity_bytes()
    num_tc = _num_tensorcores()
    budget = max(min(3 * cap // 4, cap - (16 << 20)), 16 << 20)
    TB = _choose_tb(B, slab_bytes, budget, num_tc)

    weights_bytes = 2 * (3 * D * D + D) * 4    # double-buffered, grid-invariant
    needed = 6 * TB * slab_bytes + weights_bytes + (4 << 20)
    vmem_limit = int(min(max(needed, 32 << 20), max(cap - (8 << 20), 32 << 20)))

    kernel = _make_dain_kernel(time_axis)

    out = pl.pallas_call(
        kernel,
        out_shape=jax.ShapeDtypeStruct(xk.shape, x.dtype),
        grid_spec=pltpu.PrefetchScalarGridSpec(
            num_scalar_prefetch=0,
            grid=(B // TB,),
            in_specs=[
                pl.BlockSpec(block_of(TB), lambda b: (b, 0, 0)),  # x slab
                pl.BlockSpec((D, D), lambda b: (0, 0)),           # W_mean^T
                pl.BlockSpec((D, D), lambda b: (0, 0)),           # W_scale^T
                pl.BlockSpec((D, D), lambda b: (0, 0)),           # W_gate^T
                pl.BlockSpec((1, D), lambda b: (0, 0)),           # b_gate
            ],
            out_specs=pl.BlockSpec(block_of(TB), lambda b: (b, 0, 0)),
        ),
        compiler_params=pltpu.CompilerParams(
            dimension_semantics=("parallel",),
            vmem_limit_bytes=vmem_limit,
        ),
    )(xk, wmT, wsT, wgT, bg_row)

    return jnp.transpose(out, (0, 2, 1)) if transpose else out


def dain_full_ref(x, w_mean, w_scale, w_gate, b_gate):
    """Pure-JAX mirror of DAIN_Layer.forward(mode='full') (faithful 3-reduction form)."""
    avg = jnp.mean(x, axis=2)                                  # (B, D)
    adaptive_avg = avg @ w_mean.T
    x = x - adaptive_avg[:, :, None]
    std = jnp.sqrt(jnp.mean(x * x, axis=2) + EPS)
    adaptive_std = std @ w_scale.T
    adaptive_std = jnp.where(adaptive_std <= EPS, 1.0, adaptive_std)
    x = x / adaptive_std[:, :, None]
    avg2 = jnp.mean(x, axis=2)
    gate = jax.nn.sigmoid(avg2 @ w_gate.T + b_gate)
    return x * gate[:, :, None]


if __name__ == "__main__":
    B, D, T = 2, 144, 16   # input_dim=144 (module default), small batch/seq

    key = jax.random.PRNGKey(0)
    kx, kg, kb = jax.random.split(key, 3)

    x = jax.random.normal(kx, (B, D, T), dtype=jnp.float32)

    # Deterministic parameter init mirroring __init__:
    #   mean_layer / scaling_layer weights = identity, gating_layer = dense+bias.
    w_mean = jnp.eye(D, dtype=jnp.float32)
    w_scale = jnp.eye(D, dtype=jnp.float32)
    bound = 1.0 / (D ** 0.5)
    w_gate = jax.random.uniform(kg, (D, D), jnp.float32, -bound, bound)
    b_gate = jax.random.uniform(kb, (D,), jnp.float32, -bound, bound)

    out = dain_full_pallas(x, w_mean, w_scale, w_gate, b_gate)
    out = jax.block_until_ready(out)

    ref = dain_full_ref(x, w_mean, w_scale, w_gate, b_gate)
    assert out.shape == (B, D, T)
    assert jnp.allclose(out, ref, atol=1e-5, rtol=1e-5), (
        float(jnp.max(jnp.abs(out - ref)))
    )
    print("KERNEL_OK")
</pallas_src>

<mosaic_0001>
module attributes {stable_mosaic.version = 11 : i64} {
  func.func @kernel(%arg0: i32, %arg1: memref<2x16x144xf32, #tpu.memory_space<vmem>>, %arg2: memref<144x144xf32, #tpu.memory_space<vmem>>, %arg3: memref<144x144xf32, #tpu.memory_space<vmem>>, %arg4: memref<144x144xf32, #tpu.memory_space<vmem>>, %arg5: memref<1x144xf32, #tpu.memory_space<vmem>>, %arg6: memref<2x16x144xf32, #tpu.memory_space<vmem>>) attributes {dimension_semantics = [#tpu.dimension_semantics<parallel>], iteration_bounds = array<i64: 1>, scalar_prefetch = 0 : i64, scratch_operands = 0 : i64, tpu.core_type = #tpu.core_type<tc>, window_params = [{transform_indices = @transform_0, window_bounds = array<i64: 2, 16, 144>}, {pipeline_mode = #tpu.pipeline_mode<synchronous>, transform_indices = @transform_1, window_bounds = array<i64: 144, 144>}, {pipeline_mode = #tpu.pipeline_mode<synchronous>, transform_indices = @transform_2, window_bounds = array<i64: 144, 144>}, {pipeline_mode = #tpu.pipeline_mode<synchronous>, transform_indices = @transform_3, window_bounds = array<i64: 144, 144>}, {pipeline_mode = #tpu.pipeline_mode<synchronous>, transform_indices = @transform_4, window_bounds = array<i64: 1, 144>}, {transform_indices = @transform_5, window_bounds = array<i64: 2, 16, 144>}]} {
    %c0 = arith.constant 0 : index
    %c0_0 = arith.constant 0 : index
    %c0_1 = arith.constant 0 : index
    %0 = vector.load %arg1[%c0, %c0_0, %c0_1] : memref<2x16x144xf32, #tpu.memory_space<vmem>>, vector<2x16x144xf32>
    %cst = arith.constant dense<0.000000e+00> : vector<2x144xf32>
    %1 = vector.multi_reduction <add>, %0, %cst [1] : vector<2x16x144xf32> to vector<2x144xf32>
    %cst_2 = arith.constant 6.250000e-02 : f32
    %2 = vector.broadcast %cst_2 : f32 to vector<2x144xf32>
    %3 = arith.mulf %1, %2 : vector<2x144xf32>
    %c0_3 = arith.constant 0 : index
    %c0_4 = arith.constant 0 : index
    %4 = vector.load %arg2[%c0_3, %c0_4] : memref<144x144xf32, #tpu.memory_space<vmem>>, vector<144x144xf32>
    %cst_5 = arith.constant dense<0.000000e+00> : vector<2x144xf32>
    %5 = tpu.matmul %3, %4, %cst_5 {dimension_numbers = #tpu.dot_dimension_numbers<[1], [0], [0], [1], [0, 0, 1, 1], [], []>} : vector<2x144xf32>, vector<144x144xf32>, vector<2x144xf32> -> vector<2x144xf32>
    %6 = vector.shape_cast %5 : vector<2x144xf32> to vector<2x1x144xf32>
    %7 = vector.broadcast %6 : vector<2x1x144xf32> to vector<2x16x144xf32>
    %8 = arith.subf %0, %7 : vector<2x16x144xf32>
    %9 = arith.mulf %8, %8 : vector<2x16x144xf32>
    %cst_6 = arith.constant dense<0.000000e+00> : vector<2x144xf32>
    %10 = vector.multi_reduction <add>, %9, %cst_6 [1] : vector<2x16x144xf32> to vector<2x144xf32>
    %cst_7 = arith.constant 6.250000e-02 : f32
    %11 = vector.broadcast %cst_7 : f32 to vector<2x144xf32>
    %12 = arith.mulf %10, %11 : vector<2x144xf32>
    %cst_8 = arith.constant 9.99999993E-9 : f32
    %13 = vector.broadcast %cst_8 : f32 to vector<2x144xf32>
    %14 = arith.addf %12, %13 : vector<2x144xf32>
    %15 = math.sqrt %14 : vector<2x144xf32>
    %c0_9 = arith.constant 0 : index
    %c0_10 = arith.constant 0 : index
    %16 = vector.load %arg3[%c0_9, %c0_10] : memref<144x144xf32, #tpu.memory_space<vmem>>, vector<144x144xf32>
    %cst_11 = arith.constant dense<0.000000e+00> : vector<2x144xf32>
    %17 = tpu.matmul %15, %16, %cst_11 {dimension_numbers = #tpu.dot_dimension_numbers<[1], [0], [0], [1], [0, 0, 1, 1], [], []>} : vector<2x144xf32>, vector<144x144xf32>, vector<2x144xf32> -> vector<2x144xf32>
    %cst_12 = arith.constant 9.99999993E-9 : f32
    %18 = vector.broadcast %cst_12 : f32 to vector<2x144xf32>
    %19 = arith.cmpf ole, %17, %18 : vector<2x144xf32>
    %cst_13 = arith.constant 1.000000e+00 : f32
    %20 = vector.broadcast %cst_13 : f32 to vector<2x144xf32>
    %21 = arith.select %19, %20, %17 : vector<2x144xi1>, vector<2x144xf32>
    %cst_14 = arith.constant 1.000000e+00 : f32
    %22 = vector.broadcast %cst_14 : f32 to vector<2x144xf32>
    %23 = arith.divf %22, %21 : vector<2x144xf32>
    %24 = arith.subf %3, %5 : vector<2x144xf32>
    %25 = arith.mulf %24, %23 : vector<2x144xf32>
    %c0_15 = arith.constant 0 : index
    %c0_16 = arith.constant 0 : index
    %26 = vector.load %arg4[%c0_15, %c0_16] : memref<144x144xf32, #tpu.memory_space<vmem>>, vector<144x144xf32>
    %cst_17 = arith.constant dense<0.000000e+00> : vector<2x144xf32>
    %27 = tpu.matmul %25, %26, %cst_17 {dimension_numbers = #tpu.dot_dimension_numbers<[1], [0], [0], [1], [0, 0, 1, 1], [], []>} : vector<2x144xf32>, vector<144x144xf32>, vector<2x144xf32> -> vector<2x144xf32>
    %c0_18 = arith.constant 0 : index
    %c0_19 = arith.constant 0 : index
    %28 = vector.load %arg5[%c0_18, %c0_19] : memref<1x144xf32, #tpu.memory_space<vmem>>, vector<1x144xf32>
    %29 = vector.broadcast %28 : vector<1x144xf32> to vector<2x144xf32>
    %30 = arith.addf %27, %29 : vector<2x144xf32>
    %31 = arith.negf %30 : vector<2x144xf32>
    %32 = math.exp %31 : vector<2x144xf32>
    %cst_20 = arith.constant 1.000000e+00 : f32
    %33 = vector.broadcast %cst_20 : f32 to vector<2x144xf32>
    %34 = arith.addf %33, %32 : vector<2x144xf32>
    %35 = arith.divf %33, %34 : vector<2x144xf32>
    %36 = arith.mulf %35, %23 : vector<2x144xf32>
    %37 = vector.shape_cast %36 : vector<2x144xf32> to vector<2x1x144xf32>
    %38 = vector.broadcast %6 : vector<2x1x144xf32> to vector<2x16x144xf32>
    %39 = arith.subf %0, %38 : vector<2x16x144xf32>
    %40 = vector.broadcast %37 : vector<2x1x144xf32> to vector<2x16x144xf32>
    %41 = arith.mulf %39, %40 : vector<2x16x144xf32>
    %c0_21 = arith.constant 0 : index
    %c0_22 = arith.constant 0 : index
    %c0_23 = arith.constant 0 : index
    %42 = vector.load %arg6[%c0_21, %c0_22, %c0_23] : memref<2x16x144xf32, #tpu.memory_space<vmem>>, vector<2x16x144xf32>
    tpu.vector_store %arg6[%c0_21, %c0_22, %c0_23], %41 {strides = array<i32>} : memref<2x16x144xf32, #tpu.memory_space<vmem>>, vector<2x16x144xf32>,
    return
  }
  func.func @transform_0(%arg0: i32) -> (i32, i32, i32) {
    %c0_i32 = arith.constant 0 : i32
    %c0_i32_0 = arith.constant 0 : i32
    %c0_i32_1 = arith.constant 0 : i32
    return %arg0, %c0_i32, %c0_i32_0 : i32, i32, i32
  }
  func.func @transform_1(%arg0: i32) -> (i32, i32) {
    %c0_i32 = arith.constant 0 : i32
    %c0_i32_0 = arith.constant 0 : i32
    %c0_i32_1 = arith.constant 0 : i32
    return %c0_i32, %c0_i32_0 : i32, i32
  }
  func.func @transform_2(%arg0: i32) -> (i32, i32) {
    %c0_i32 = arith.constant 0 : i32
    %c0_i32_0 = arith.constant 0 : i32
    %c0_i32_1 = arith.constant 0 : i32
    return %c0_i32, %c0_i32_0 : i32, i32
  }
  func.func @transform_3(%arg0: i32) -> (i32, i32) {
    %c0_i32 = arith.constant 0 : i32
    %c0_i32_0 = arith.constant 0 : i32
    %c0_i32_1 = arith.constant 0 : i32
    return %c0_i32, %c0_i32_0 : i32, i32
  }
  func.func @transform_4(%arg0: i32) -> (i32, i32) {
    %c0_i32 = arith.constant 0 : i32
    %c0_i32_0 = arith.constant 0 : i32
    %c0_i32_1 = arith.constant 0 : i32
    return %c0_i32, %c0_i32_0 : i32, i32
  }
  func.func @transform_5(%arg0: i32) -> (i32, i32, i32) {
    %c0_i32 = arith.constant 0 : i32
    %c0_i32_0 = arith.constant 0 : i32
    %c0_i32_1 = arith.constant 0 : i32
    return %arg0, %c0_i32, %c0_i32_0 : i32, i32, i32
  }
}

</mosaic_0001>

<bundles_post_ra>
// kernel: tpu_custom_call.1
= control target key start
LH: loop header
LB: loop body
LE: loop exit
PB: predicated region body
PF: predicated region fallthrough
CT: control target
= control target key end

     0   :  { %10 = vsyncpa [#allocation3], 0  ;;  %s1144_s0 = inlined_call_operand.hbm [shape: f32[2,16,144], index: 0, kind: input, shape index: {}]   ;;  %s1145_s1 = inlined_call_operand.hbm [shape: f32[144,144], index: 1, kind: input, shape index: {}]   ;;  %s1146_s2 = inlined_call_operand.hbm [shape: f32[144,144], index: 2, kind: input, shape index: {}]   ;;  %s1147_s3 = inlined_call_operand.hbm [shape: f32[144,144], index: 3, kind: input, shape index: {}]   ;;  %s1148_s4 = inlined_call_operand.vmem [shape: f32[1,144], index: 4, kind: input, shape index: {}]   ;;  %s1149_s5 = inlined_call_operand.hbm [shape: f32[2,16,144], index: 5, kind: output, shape index: {}]  }
   0x1   :  { %11 = vsyncpa [#allocation6], 0 }
   0x2   :  { %12 = vsyncpa [#allocation9], 0 }
   0x3   :  { %13 = vsyncpa [#allocation4], 0  ;;  %s31_s20 = sshll.u32 %s1145_s1, 4  ;;  %s942_s21 = smov [#allocation5]   ;;  %s32_s20 = int_to_ptr.hbm [resolvable:$true] %s31_s20 }
   0x4   :  { %s33_s22 = sshll.u32 %s942_s21, 4  ;;  %s18_s25 = sshll.u32 %s1144_s0, 4  ;;  %s34_s22 = int_to_ptr.vmem [resolvable:$true] %s33_s22  ;;  %s19_s25 = int_to_ptr.hbm [resolvable:$true] %s18_s25 }
   0x5   :  { %s943_s26 = smov 256   ;;  %s944_s27 = smov 16  }
   0x6   :  { %39 = dma.hbm_to_vmem [thread:$0]  %s32_s20, 4608, %s34_s22, [#allocation6], %s943_s26, %s943_s26, %s944_s27  }
   0x7   :  { %s945_s28 = smov [#allocation2]   ;;  %s44_s1 = sshll.u32 %s1146_s2, 4  ;;  %s45_s1 = int_to_ptr.hbm [resolvable:$true] %s44_s1 }
   0x8   :  { %s20_s29 = sshll.u32 %s945_s28, 4  ;;  %s57_s8 = sshll.u32 %s1147_s3, 4  ;;  %s21_s29 = int_to_ptr.vmem [resolvable:$true] %s20_s29  ;;  %s58_s8 = int_to_ptr.hbm [resolvable:$true] %s57_s8 }
   0x9   :  { %26 = dma.hbm_to_vmem [thread:$0]  %s19_s25, 1024, %s21_s29, [#allocation3], %s943_s26, %s943_s26, %s944_s27  }
   0xa   :  { %s946_s9 = smov [#allocation7]   ;;  %s947_s11 = smov [#allocation8]  }
   0xb   :  { %s46_s10 = sshll.u32 %s946_s9, 4  ;;  %s59_s2 = sshll.u32 %s947_s11, 4  ;;  %s47_s10 = int_to_ptr.vmem [resolvable:$true] %s46_s10  ;;  %s60_s2 = int_to_ptr.vmem [resolvable:$true] %s59_s2 }
   0xc   :  { %52 = dma.hbm_to_vmem [thread:$0]  %s45_s1, 4608, %s47_s10, [#allocation6], %s943_s26, %s943_s26, %s944_s27  }
   0xd   :  { %65 = dma.hbm_to_vmem [thread:$0]  %s58_s8, 4608, %s60_s2, [#allocation9], %s943_s26, %s943_s26, %s944_s27  }
   0xe   :  { %934 = dma.done.wait [#allocation3], 1024  }
   0xf   :  { %935 = vsyncadd [#allocation3], 4294966272 }
  0x10   :  { %936 = dma.done.wait [#allocation6], 9216  }
  0x11   :  { %937 = vsyncadd [#allocation6], 4294958080 }
  0x12   :  { %938 = dma.done.wait [#allocation9], 4608  }
  0x13   :  { %939 = vsyncadd [#allocation9], 4294962688  ;;  %v160_v0 = vld [vmem:[#allocation5 + $0xf8] sm:$0xff]  ;;  %v158_v1 = vld [vmem:[#allocation5 + $0xe8] sm:$0xff]  ;;  %vm99_vm0 = vcmask 130048   ;;  %vm169_vm1 = vcmask 1041409  }
  0x14   :  { %215 = vmatpush.msra.mxu2 %v160_v0  ;;  %v159_v2 = vld [vmem:[#allocation5 + $0xf0] sm:$0xff]  ;;  %v156_v3 = vld [vmem:[#allocation5 + $0xd8] sm:$0xff]  ;;  %v157_v4 = vld [vmem:[#allocation5 + $0xe0] sm:$0xff]  ;;  %vm258_vm2 = vcmask 1040384   ;;  %s764_s16 = sshll.u32 %s1149_s5, 4  ;;  %s765_s16 = int_to_ptr.hbm [resolvable:$true] %s764_s16 }
  0x15   :  { %175 = vmatpush.msra.mxu0 %v159_v2  ;;  %v155_v5 = vld [vmem:[#allocation5 + $0xd0] sm:$0xff]  ;;  %v154_v6 = vld [vmem:[#allocation5 + $0xc8] sm:$0xff]  ;;  %v153_v7 = vld [vmem:[#allocation5 + $0xc0] sm:$0xff] }
  0x16   :  { %216 = vmatpush.msra.mxu2 %v158_v1  ;;  %v152_v8 = vld [vmem:[#allocation5 + $0xb8] sm:$0xff]  ;;  %v151_v9 = vld [vmem:[#allocation5 + $0xb0] sm:$0xff]  ;;  %v150_v10 = vld [vmem:[#allocation5 + $0xa8] sm:$0xff] }
  0x17   :  { %176 = vmatpush.msra.mxu0 %v157_v4  ;;  %v148_v11 = vld [vmem:[#allocation5 + $0x98] sm:$0xff]  ;;  %v149_v13 = vld [vmem:[#allocation5 + $0xa0] sm:$0xff]  ;;  %v147_v14 = vld [vmem:[#allocation5 + $0x90] sm:$0xff] }
  0x18   :  { %217 = vmatpush.msra.mxu2 %v156_v3  ;;  %v164_v12 = vld [vmem:[#allocation5 + $0x118] sm:$0xff]  ;;  %v162_v15 = vld [vmem:[#allocation5 + $0x108] sm:$0xff]  ;;  %v1003_v16 = vld [vmem:[#allocation2] sm:$0xff] }
  0x19   :  { %177 = vmatpush.msra.mxu0 %v155_v5  ;;  %249 = vmatpush.msra.mxu3 %v164_v12  ;;  %v1005_v17 = vld [vmem:[#allocation2 + $0x10] sm:$0xff]  ;;  %v1007_v18 = vld [vmem:[#allocation2 + $0x20] sm:$0xff]  ;;  %v1013_v21 = vld [vmem:[#allocation2 + $0x8] sm:$0xff] }
  0x1a   :  { %218 = vmatpush.msra.mxu2 %v154_v6  ;;  %v1009_v19 = vld [vmem:[#allocation2 + $0x30] sm:$0xff]  ;;  %v92_v20 = vadd.f32 %v1005_v17, %v1003_v16  ;;  %v1015_v22 = vld [vmem:[#allocation2 + $0x18] sm:$0xff]  ;;  %v146_v23 = vld [vmem:[#allocation5 + $0x88] sm:$0xff]  ;;  %v100_v27 = vsel %vm99_vm0, %v1013_v21, 0.0 }
  0x1b   :  { %178 = vmatpush.msra.mxu0 %v153_v7  ;;  %250 = vmatpush.msra.mxu3 %v162_v15  ;;  %v109_v24 = vadd.f32 %v1009_v19, %v1007_v18  ;;  %v1019_v25 = vld [vmem:[#allocation2 + $0x28] sm:$0xff]  ;;  %v1021_v26 = vld [vmem:[#allocation2 + $0x38] sm:$0xff]  ;;  %v101_v28 = vsel %vm99_vm0, %v1015_v22, 0.0  ;;  %v145_v29 = vld [vmem:[#allocation5 + $0x80] sm:$0xff] }
  0x1c   :  { %219 = vmatpush.msra.mxu2 %v152_v8  ;;  %v93_v30 = vrot.slane %v92_v20, 4  ;;  %v102_v31 = vadd.f32 %v101_v28, %v100_v27  ;;  %v116_v32 = vsel %vm99_vm0, %v1019_v25, 0.0  ;;  %v117_v33 = vsel %vm99_vm0, %v1021_v26, 0.0  ;;  %v163_v34 = vld [vmem:[#allocation5 + $0x110] sm:$0xff]  ;;  %v144_v35 = vld [vmem:[#allocation5 + $0x78] sm:$0xff]  ;;  %v161_v38 = vld [vmem:[#allocation5 + $0x100] sm:$0xff] }
  0x1d   :  { %179 = vmatpush.msra.mxu0 %v151_v9  ;;  %v110_v36 = vrot.slane %v109_v24, 4  ;;  %v118_v37 = vadd.f32 %v117_v33, %v116_v32  ;;  %209 = vmatpush.msra.mxu1 %v163_v34  ;;  %v143_v39 = vld [vmem:[#allocation5 + $0x70] sm:$0xff]  ;;  %v142_v42 = vld [vmem:[#allocation5 + $0x68] sm:$0xff]  ;;  %v141_v45 = vld [vmem:[#allocation5 + $0x60] sm:$0xff] }
  0x1e   :  { %220 = vmatpush.msra.mxu2 %v150_v10  ;;  %v94_v40 = vadd.f32 %v93_v30, %v92_v20  ;;  %v103_v41 = vrot.slane %v102_v31, 4  ;;  %v140_v48 = vld [vmem:[#allocation5 + $0x58] sm:$0xff]  ;;  %v139_v51 = vld [vmem:[#allocation5 + $0x50] sm:$0xff]  ;;  %v138_v54 = vld [vmem:[#allocation5 + $0x48] sm:$0xff] }
  0x1f   :  { %180 = vmatpush.msra.mxu0 %v149_v13  ;;  %v111_v43 = vadd.f32 %v110_v36, %v109_v24  ;;  %v119_v44 = vrot.slane %v118_v37, 4  ;;  %210 = vmatpush.msra.mxu1 %v161_v38  ;;  %v137_v57 = vld [vmem:[#allocation5 + $0x40] sm:$0xff]  ;;  %v136_v60 = vld [vmem:[#allocation5 + $0x38] sm:$0xff]  ;;  %v135_v1 = vld [vmem:[#allocation5 + $0x30] sm:$0xff] }
  0x20   :  { %221 = vmatpush.msra.mxu2 %v148_v11  ;;  %v95_v46 = vrot.slane %v94_v40, 2  ;;  %v104_v47 = vadd.f32 %v103_v41, %v102_v31  ;;  %v134_v2 = vld [vmem:[#allocation5 + $0x28] sm:$0xff]  ;;  %v133_v7 = vld [vmem:[#allocation5 + $0x20] sm:$0xff]  ;;  %v132_v8 = vld [vmem:[#allocation5 + $0x18] sm:$0xff] }
  0x21   :  { %181 = vmatpush.msra.mxu0 %v147_v14  ;;  %v112_v49 = vrot.slane %v111_v43, 2  ;;  %v120_v50 = vadd.f32 %v119_v44, %v118_v37  ;;  %v131_v12 = vld [vmem:[#allocation5 + $0x10] sm:$0xff]  ;;  %v130_v13 = vld [vmem:[#allocation5 + $0x8] sm:$0xff]  ;;  %v129_v20 = vld [vmem:[#allocation5] sm:$0xff] }
  0x22   :  { %222 = vmatpush.msra.mxu2 %v146_v23  ;;  %v96_v52 = vadd.f32 %v95_v46, %v94_v40  ;;  %v105_v53 = vrot.slane %v104_v47, 2  ;;  %v404_v24 = vld [vmem:[#allocation7 + $0xf0] sm:$0xff]  ;;  %v402_v27 = vld [vmem:[#allocation7 + $0xe0] sm:$0xff]  ;;  %v405_v36 = vld [vmem:[#allocation7 + $0xf8] sm:$0xff] }
  0x23   :  { %182 = vmatpush.msra.mxu0 %v145_v29  ;;  %v113_v55 = vadd.f32 %v112_v49, %v111_v43  ;;  %v121_v56 = vrot.slane %v120_v50, 2  ;;  %419 = vmatpush.msrb.mxu1 %v404_v24  ;;  %v400_v28 = vld [vmem:[#allocation7 + $0xd0] sm:$0xff]  ;;  %v398_v29 = vld [vmem:[#allocation7 + $0xc0] sm:$0xff]  ;;  %v401_v43 = vld [vmem:[#allocation7 + $0xd8] sm:$0xff] }
  0x24   :  { %223 = vmatpush.msra.mxu2 %v144_v35  ;;  %v97_v58 = vrot.slane %v96_v52, 1  ;;  %v106_v59 = vadd.f32 %v105_v53, %v104_v47  ;;  %v408_v30 = vld [vmem:[#allocation7 + $0x110] sm:$0xff]  ;;  %v406_v35 = vld [vmem:[#allocation7 + $0x100] sm:$0xff]  ;;  %v399_v46 = vld [vmem:[#allocation7 + $0xc8] sm:$0xff] }
  0x25   :  { %183 = vmatpush.msra.mxu0 %v143_v39  ;;  %v114_v61 = vrot.slane %v113_v55, 1  ;;  %v122_v62 = vadd.f32 %v121_v56, %v120_v50  ;;  %420 = vmatpush.msrb.mxu1 %v402_v27  ;;  %v396_v34 = vld [vmem:[#allocation7 + $0xb0] sm:$0xff]  ;;  %v394_v38 = vld [vmem:[#allocation7 + $0xa0] sm:$0xff]  ;;  %v403_v39 = vld [vmem:[#allocation7 + $0xe8] sm:$0xff] }
  0x26   :  { %224 = vmatpush.msra.mxu2 %v142_v42  ;;  %v98_v63 = vadd.f32 %v97_v58, %v96_v52  ;;  %v107_v0 = vrot.slane %v106_v59, 1  ;;  %453 = vmatpush.msrb.mxu3 %v408_v30  ;;  %v392_v42 = vld [vmem:[#allocation7 + $0x90] sm:$0xff]  ;;  %v397_v53 = vld [vmem:[#allocation7 + $0xb8] sm:$0xff] }
  0x27   :  { %184 = vmatpush.msra.mxu0 %v141_v45  ;;  %v115_v3 = vadd.f32 %v114_v61, %v113_v55  ;;  %v123_v4 = vrot.slane %v122_v62, 1  ;;  %421 = vmatpush.msrb.mxu1 %v400_v28  ;;  %v390_v45 = vld [vmem:[#allocation7 + $0x80] sm:$0xff]  ;;  %v388_v49 = vld [vmem:[#allocation7 + $0x70] sm:$0xff]  ;;  %v389_v24 = vld [vmem:[#allocation7 + $0x78] sm:$0xff] }
  0x28   :  { %225 = vmatpush.msra.mxu2 %v140_v48  ;;  %v1031_v5 = vmul.f32 0.0625, %v98_v63  ;;  %v108_v6 = vadd.f32 %v107_v0, %v106_v59  ;;  %454 = vmatpush.msrb.mxu3 %v406_v35  ;;  %v395_v59 = vld [vmem:[#allocation7 + $0xa8] sm:$0xff]  ;;  %v376_v35 = vld [vmem:[#allocation7 + $0x10] sm:$0xff] }
  0x29   :  { %185 = vmatpush.msra.mxu0 %v139_v51  ;;  %v1033_v9 = vmul.f32 0.0625, %v115_v3  ;;  %v124_v10 = vadd.f32 %v123_v4, %v122_v62  ;;  %422 = vmatpush.msrb.mxu1 %v398_v29  ;;  %v384_v62 = vld [vmem:[#allocation7 + $0x50] sm:$0xff]  ;;  %v378_v29 = vld [vmem:[#allocation7 + $0x20] sm:$0xff] }
  0x2a   :  { %226 = vmatpush.msra.mxu2 %v138_v54  ;;  %v1035_v11 = vmul.f32 0.0625, %v108_v6  ;;  %v386_v54 = vld [vmem:[#allocation7 + $0x60] sm:$0xff]  ;;  %v391_v6 = vld [vmem:[#allocation7 + $0x88] sm:$0xff] }
  0x2b   :  { %186 = vmatpush.msra.mxu0 %v137_v57  ;;  %v1037_v14 = vmul.f32 0.0625, %v124_v10  ;;  %v170_v15 = vsel %vm169_vm1, %v1033_v9, %v1031_v5  ;;  %423 = vmatpush.msrb.mxu1 %v396_v34 }
  0x2c   :  { %227 = vmatpush.msra.mxu2 %v136_v60 }
  0x2d   :  { %187 = vmatpush.msra.mxu0 %v135_v1  ;;  %v171_v23 = vsel %vm169_vm1, %v1037_v14, %v1035_v11  ;;  %424 = vmatpush.msrb.mxu1 %v394_v38  ;;  %v385_v38 = vld [vmem:[#allocation7 + $0x58] sm:$0xff] }
  0x2e   :  { %228 = vmatpush.msra.mxu2 %v134_v2  ;;  %780 = vmatmul.msk.f32.vlgmr.msra.gmra.mxu3 %vm99_vm0, %v171_v23 }
  0x2f   :  { %188 = vmatpush.msra.mxu0 %v133_v7  ;;  %779 = vmatmul.msk.f32.vlgmr.msra.gmra.mxu1 %vm99_vm0, %v171_v23 }
  0x30   :  { %229 = vmatpush.msra.mxu2 %v132_v8  ;;  %459 = vmatpush.msra.mxu3 %v405_v36 }
  0x31   :  { %189 = vmatpush.msra.mxu0 %v131_v12  ;;  %425 = vmatpush.msrb.mxu1 %v392_v42  ;;  %v380_v12 = vld [vmem:[#allocation7 + $0x30] sm:$0xff] }
  0x32   :  { %230 = vmatpush.msra.mxu2 %v130_v13  ;;  %460 = vmatpush.msra.mxu3 %v403_v39 }
  0x33   :  { %231 = vmatmul.f32.vlgmr.msra.gmra.mxu2 %v170_v15  ;;  %190 = vmatpush.msra.mxu0 %v129_v20 }
  0x34   :  { %191 = vmatmul.f32.vlgmr.msra.gmra.mxu0 %v170_v15  ;;  %461 = vmatpush.msra.mxu3 %v401_v43  ;;  %v374_v43 = vld [vmem:[#allocation7] sm:$0xff] }
  0x35   :  { %426 = vmatpush.msrb.mxu1 %v390_v45 }
  0x36   :  { %462 = vmatpush.msra.mxu3 %v399_v46 }
  0x37   :  { %427 = vmatpush.msrb.mxu1 %v388_v49 }
  0x38   :  { %463 = vmatpush.msra.mxu3 %v397_v53 }
  0x39   :  { %428 = vmatpush.msrb.mxu1 %v386_v54 }
  0x3a   :  { %464 = vmatpush.msra.mxu3 %v395_v59 }
  0x3b   :  { %429 = vmatpush.msrb.mxu1 %v384_v62 }
  0xac   :  { %v212_v32 = vpop.f32.mrf.mxu1 }
  0xb1   :  { %v192_v31 = vpop.f32.mrf.mxu0  ;;  %v252_v33 = vpop.f32.mrf.mxu3 }
  0xb2   :  { %v1049_v41 = vadd.f32 %v212_v32, %v192_v31  ;;  %v387_v32 = vld [vmem:[#allocation7 + $0x68] sm:$0xff] }
  0xb6   :  { %v232_v37 = vpop.f32.mrf.mxu2 }
  0xb7   :  { %v1047_v40 = vadd.f32 %v252_v33, %v232_v37 }
  0xb9   :  { %v257_v44 = vrot.slane %v1047_v40, 7 }
  0xbb   :  { %v259_v47 = vsel %vm258_vm2, %v1049_v41, %v257_v44  ;;  %v260_v48 = vsel %vm169_vm1, %v1049_v41, %v257_v44 }
  0xbc   :  { %v261_v50 = vrot.slane %v260_v48, 1  ;;  %v262_v51 = vperm.slane %v259_v47, 0  ;;  %v263_v52 = vperm.slane %v259_v47, 1 }
  0xbe   :  { %v264_v55 = vperm.slane %v261_v50, 0  ;;  %v265_v56 = vperm.slane %v261_v50, 1  ;;  %v1057_v57 = vsub.f32 %v1003_v16, %v262_v51  ;;  %v1060_v58 = vsub.f32 %v1013_v21, %v263_v52  ;;  %v383_v50 = vld [vmem:[#allocation7 + $0x48] sm:$0xff] }
  0xbf   :  { %v1063_v60 = vsub.f32 %v1005_v17, %v262_v51  ;;  %v1066_v61 = vsub.f32 %v1015_v22, %v263_v52  ;;  %v393_v17 = vld [vmem:[#allocation7 + $0x98] sm:$0xff] }
  0xc0   :  { %v1069_v63 = vsub.f32 %v1007_v18, %v264_v55  ;;  %v1072_v0 = vsub.f32 %v1019_v25, %v265_v56  ;;  %v1075_v16 = vsub.f32 %v1009_v19, %v264_v55  ;;  %v1078_v21 = vsub.f32 %v1021_v26, %v265_v56  ;;  %v382_v19 = vld [vmem:[#allocation7 + $0x40] sm:$0xff]  ;;  %465 = vmatpush.msra.mxu3 %v393_v17  ;;  %v381_v55 = vld [vmem:[#allocation7 + $0x38] sm:$0xff]  ;;  %v379_v56 = vld [vmem:[#allocation7 + $0x28] sm:$0xff] }
  0xc1   :  { %v278_v22 = vmul.f32 %v1057_v57, %v1057_v57  ;;  %v279_v1 = vmul.f32 %v1060_v58, %v1060_v58  ;;  %v280_v18 = vmul.f32 %v1063_v60, %v1063_v60  ;;  %v281_v25 = vmul.f32 %v1066_v61, %v1066_v61  ;;  %430 = vmatpush.msrb.mxu1 %v382_v19 }
  0xc2   :  { %v282_v26 = vmul.f32 %v1069_v63, %v1069_v63  ;;  %v283_v2 = vmul.f32 %v1072_v0, %v1072_v0  ;;  %v284_v3 = vmul.f32 %v1075_v16, %v1075_v16  ;;  %v285_v4 = vmul.f32 %v1078_v21, %v1078_v21  ;;  %466 = vmatpush.msra.mxu3 %v391_v6 }
  0xc3   :  { %v286_v7 = vadd.f32 %v280_v18, %v278_v22  ;;  %v293_v8 = vsel %vm99_vm0, %v279_v1, 0.0  ;;  %v294_v10 = vsel %vm99_vm0, %v281_v25, 0.0  ;;  %431 = vmatpush.msrb.mxu1 %v380_v12  ;;  %v377_v1 = vld [vmem:[#allocation7 + $0x18] sm:$0xff] }
  0xc4   :  { %v295_v13 = vadd.f32 %v294_v10, %v293_v8  ;;  %v302_v15 = vadd.f32 %v284_v3, %v282_v26  ;;  %v309_v20 = vsel %vm99_vm0, %v283_v2, 0.0  ;;  %v310_v23 = vsel %vm99_vm0, %v285_v4, 0.0  ;;  %467 = vmatpush.msra.mxu3 %v389_v24  ;;  %v375_v2 = vld [vmem:[#allocation7 + $0x8] sm:$0xff] }
  0xc5   :  { %v287_v27 = vrot.slane %v286_v7, 4  ;;  %v311_v28 = vadd.f32 %v310_v23, %v309_v20  ;;  %432 = vmatpush.msrb.mxu1 %v378_v29 }
  0xc6   :  { %v296_v30 = vrot.slane %v295_v13, 4  ;;  %v303_v31 = vrot.slane %v302_v15, 4  ;;  %468 = vmatpush.msra.mxu3 %v387_v32 }
  0xc7   :  { %v288_v33 = vadd.f32 %v287_v27, %v286_v7  ;;  %v312_v34 = vrot.slane %v311_v28, 4  ;;  %433 = vmatpush.msrb.mxu1 %v376_v35 }
  0xc8   :  { %v297_v36 = vadd.f32 %v296_v30, %v295_v13  ;;  %v304_v37 = vadd.f32 %v303_v31, %v302_v15  ;;  %469 = vmatpush.msra.mxu3 %v385_v38 }
  0xc9   :  { %v289_v39 = vrot.slane %v288_v33, 2  ;;  %v313_v42 = vadd.f32 %v312_v34, %v311_v28  ;;  %434 = vmatpush.msrb.mxu1 %v374_v43 }
  0xca   :  { %v298_v44 = vrot.slane %v297_v36, 2  ;;  %v305_v45 = vrot.slane %v304_v37, 2  ;;  %470 = vmatpush.msra.mxu3 %v383_v50 }
  0xcb   :  { %v290_v46 = vadd.f32 %v289_v39, %v288_v33  ;;  %v314_v47 = vrot.slane %v313_v42, 2 }
  0xcc   :  { %v299_v48 = vadd.f32 %v298_v44, %v297_v36  ;;  %v306_v49 = vadd.f32 %v305_v45, %v304_v37  ;;  %471 = vmatpush.msra.mxu3 %v381_v55 }
  0xcd   :  { %v291_v51 = vrot.slane %v290_v46, 1  ;;  %v315_v52 = vadd.f32 %v314_v47, %v313_v42 }
  0xce   :  { %v300_v53 = vrot.slane %v299_v48, 1  ;;  %v307_v54 = vrot.slane %v306_v49, 1  ;;  %472 = vmatpush.msra.mxu3 %v379_v56 }
  0xcf   :  { %v292_v59 = vadd.f32 %v291_v51, %v290_v46  ;;  %v316_v62 = vrot.slane %v315_v52, 1 }
  0xd0   :  { %v301_v17 = vadd.f32 %v300_v53, %v299_v48  ;;  %v308_v22 = vadd.f32 %v307_v54, %v306_v49  ;;  %473 = vmatpush.msra.mxu3 %v377_v1 }
  0xd1   :  { %v317_v18 = vadd.f32 %v316_v62, %v315_v52  ;;  %v318_v25 = vmul.f32 0.0625, %v292_v59 }
  0xd2   :  { %v319_v19 = vmul.f32 0.0625, %v301_v17  ;;  %v320_v26 = vmul.f32 0.0625, %v308_v22  ;;  %474 = vmatpush.msra.mxu3 %v375_v2  ;;  %v585_v2 = vld [vmem:[#allocation8 + $0xf0] sm:$0xff] }
  0xd3   :  { %v321_v3 = vmul.f32 0.0625, %v317_v18  ;;  %v322_v4 = vadd.f32 1e-08, %v318_v25  ;;  %v409_v25 = vld [vmem:[#allocation7 + $0x118] sm:$0xff]  ;;  %608 = vmatpush.msrb.mxu2 %v585_v2  ;;  %v533_v2 = vrot.slane %v1049_v41, 1 }
  0xd4   :  { %v323_v6 = vadd.f32 1e-08, %v319_v19  ;;  %v324_v7 = vadd.f32 1e-08, %v320_v26  ;;  %v407_v26 = vld [vmem:[#allocation7 + $0x108] sm:$0xff] }
  0xd5   :  { %v325_v8 = vadd.f32 1e-08, %v321_v3  ;;  %794 = vrsqrt.f32 %v322_v4  ;;  %vm333_vm3 = vcmp.eq.f32.partialorder %v322_v4, inf  ;;  %vm335_vm4 = vcmp.eq.f32.partialorder %v322_v4, 0.0  ;;  %v586_v3 = vld [vmem:[#allocation8 + $0xf8] sm:$0xff] }
  0xd6   :  { %796 = vrsqrt.f32 %v324_v7  ;;  %v336_v45 = vand.u32 2147483648, %v322_v4  ;;  %vm357_vm5 = vcmp.eq.f32.partialorder %v324_v7, inf  ;;  %vm359_vm6 = vcmp.eq.f32.partialorder %v324_v7, 0.0  ;;  %648 = vmatpush.msrb.mxu0 %v586_v3 }
  0xd7   :  { %798 = vrsqrt.f32 %v323_v6  ;;  %v360_v50 = vand.u32 2147483648, %v324_v7  ;;  %vm345_vm7 = vcmp.eq.f32.partialorder %v323_v6, inf  ;;  %v348_v53 = vand.u32 2147483648, %v323_v6 }
  0xd8   :  { %800 = vrsqrt.f32 %v325_v8  ;;  %vm369_vm8 = vcmp.eq.f32.partialorder %v325_v8, inf  ;;  %v372_v62 = vand.u32 2147483648, %v325_v8  ;;  %vm347_vm9 = vcmp.eq.f32.partialorder %v323_v6, 0.0 }
  0xd9   :  { %vm371_vm10 = vcmp.eq.f32.partialorder %v325_v8, 0.0 }
  0xdb   :  { %v795_v10 = vpop.eup %794 }
  0xdc   :  { %v797_v12 = vpop.eup %796  ;;  %v327_v13 = vmul.f32 %v795_v10, %v322_v4 }
  0xdd   :  { %v799_v15 = vpop.eup %798  ;;  %v351_v20 = vmul.f32 %v797_v12, %v324_v7 }
  0xde   :  { %v801_v23 = vpop.eup %800  ;;  %v328_v24 = vmul.f32 %v795_v10, %v327_v13  ;;  %v339_v27 = vmul.f32 %v799_v15, %v323_v6  ;;  %v577_v13 = vld [vmem:[#allocation8 + $0xb0] sm:$0xff] }
  0xdf   :  { %v352_v28 = vmul.f32 %v797_v12, %v351_v20  ;;  %v363_v29 = vmul.f32 %v801_v23, %v325_v8  ;;  %v575_v20 = vld [vmem:[#allocation8 + $0xa0] sm:$0xff] }
  0xe0   :  { %v329_v30 = vmul.f32 0.5, %v328_v24  ;;  %v340_v31 = vmul.f32 %v799_v15, %v339_v27  ;;  %v573_v24 = vld [vmem:[#allocation8 + $0x90] sm:$0xff]  ;;  %v574_v27 = vld [vmem:[#allocation8 + $0x98] sm:$0xff] }
  0xe1   :  { %v353_v32 = vmul.f32 0.5, %v352_v28  ;;  %v364_v33 = vmul.f32 %v801_v23, %v363_v29  ;;  %v571_v28 = vld [vmem:[#allocation8 + $0x80] sm:$0xff]  ;;  %v572_v29 = vld [vmem:[#allocation8 + $0x88] sm:$0xff] }
  0xe2   :  { %v330_v34 = vsub.f32 1.5, %v329_v30  ;;  %v341_v35 = vmul.f32 0.5, %v340_v31  ;;  %v569_v30 = vld [vmem:[#allocation8 + $0x70] sm:$0xff]  ;;  %v570_v31 = vld [vmem:[#allocation8 + $0x78] sm:$0xff] }
  0xe3   :  { %v354_v36 = vsub.f32 1.5, %v353_v32  ;;  %v365_v37 = vmul.f32 0.5, %v364_v33  ;;  %v567_v32 = vld [vmem:[#allocation8 + $0x60] sm:$0xff]  ;;  %v568_v33 = vld [vmem:[#allocation8 + $0x68] sm:$0xff] }
  0xe4   :  { %v331_v38 = vmul.f32 %v795_v10, %v330_v34  ;;  %v342_v39 = vsub.f32 1.5, %v341_v35  ;;  %v579_v10 = vld [vmem:[#allocation8 + $0xc0] sm:$0xff]  ;;  %v565_v34 = vld [vmem:[#allocation8 + $0x50] sm:$0xff]  ;;  %v566_v35 = vld [vmem:[#allocation8 + $0x58] sm:$0xff] }
  0xe5   :  { %v355_v42 = vmul.f32 %v797_v12, %v354_v36  ;;  %v366_v43 = vsub.f32 1.5, %v365_v37  ;;  %v580_v12 = vld [vmem:[#allocation8 + $0xc8] sm:$0xff]  ;;  %v563_v36 = vld [vmem:[#allocation8 + $0x40] sm:$0xff] }
  0xe6   :  { %v332_v44 = vmul.f32 %v331_v38, %v322_v4  ;;  %v343_v46 = vmul.f32 %v799_v15, %v342_v39  ;;  %v578_v15 = vld [vmem:[#allocation8 + $0xb8] sm:$0xff]  ;;  %v564_v37 = vld [vmem:[#allocation8 + $0x48] sm:$0xff]  ;;  %v561_v38 = vld [vmem:[#allocation8 + $0x30] sm:$0xff] }
  0xe7   :  { %v356_v47 = vmul.f32 %v355_v42, %v324_v7  ;;  %v367_v48 = vmul.f32 %v801_v23, %v366_v43  ;;  %v576_v23 = vld [vmem:[#allocation8 + $0xa8] sm:$0xff]  ;;  %v562_v39 = vld [vmem:[#allocation8 + $0x38] sm:$0xff]  ;;  %v559_v42 = vld [vmem:[#allocation8 + $0x20] sm:$0xff] }
  0xe8   :  { %v334_v49 = vsel %vm333_vm3, %v322_v4, %v332_v44  ;;  %v344_v51 = vmul.f32 %v343_v46, %v323_v6  ;;  %v583_v4 = vld [vmem:[#allocation8 + $0xe0] sm:$0xff]  ;;  %v560_v43 = vld [vmem:[#allocation8 + $0x28] sm:$0xff]  ;;  %v557_v44 = vld [vmem:[#allocation8 + $0x10] sm:$0xff] }
  0xe9   :  { %v358_v52 = vsel %vm357_vm5, %v324_v7, %v356_v47  ;;  %v368_v54 = vmul.f32 %v367_v48, %v325_v8  ;;  %v337_v55 = vsel %vm335_vm4, %v336_v45, %v334_v49  ;;  %609 = vmatpush.msrb.mxu2 %v583_v4  ;;  %v581_v7 = vld [vmem:[#allocation8 + $0xd0] sm:$0xff]  ;;  %v558_v45 = vld [vmem:[#allocation8 + $0x18] sm:$0xff]  ;;  %v555_v46 = vld [vmem:[#allocation8] sm:$0xff] }
  0xea   :  { %v361_v56 = vsel %vm359_vm6, %v360_v50, %v358_v52  ;;  %v346_v59 = vsel %vm345_vm7, %v323_v6, %v344_v51  ;;  %v584_v6 = vld [vmem:[#allocation8 + $0xe8] sm:$0xff]  ;;  %v589_v52 = vld [vmem:[#allocation8 + $0x110] sm:$0xff] }
  0xeb   :  { %v414_v17 = vsel %vm169_vm1, %v361_v56, %v337_v55  ;;  %v370_v22 = vsel %vm369_vm8, %v325_v8, %v368_v54  ;;  %v349_v1 = vsel %vm347_vm9, %v348_v53, %v346_v59  ;;  %649 = vmatpush.msrb.mxu0 %v584_v6  ;;  %v582_v8 = vld [vmem:[#allocation8 + $0xd8] sm:$0xff]  ;;  %610 = vmatpush.msrb.mxu2 %v581_v7  ;;  %v556_v47 = vld [vmem:[#allocation8 + $0x8] sm:$0xff]  ;;  %v587_v53 = vld [vmem:[#allocation8 + $0x100] sm:$0xff] }
  0xec   :  { %435 = vmatmul.f32.vlgmr.msrb.gmra.mxu1 %v414_v17  ;;  %v373_v18 = vsel %vm371_vm10, %v372_v62, %v370_v22  ;;  %v590_v59 = vld [vmem:[#allocation8 + $0x118] sm:$0xff]  ;;  %v588_v62 = vld [vmem:[#allocation8 + $0x108] sm:$0xff] }
  0xed   :  { %v415_v19 = vsel %vm169_vm1, %v373_v18, %v349_v1  ;;  %650 = vmatpush.msrb.mxu0 %v582_v8  ;;  %611 = vmatpush.msrb.mxu2 %v579_v10  ;;  %v541_v8 = vsub.f32 %v1033_v9, %v533_v2 }
  0xee   :  { %781 = vmatmul.msk.f32.vlgmr.msrb.gmra.mxu3 %vm99_vm0, %v415_v19  ;;  %642 = vmatpush.msra.mxu1 %v589_v52 }
  0xef   :  { %493 = vmatpush.msrb.mxu3 %v409_v25  ;;  %651 = vmatpush.msrb.mxu0 %v580_v12  ;;  %v539_v12 = vsub.f32 %v1031_v5, %v1049_v41 }
  0xf0   :  { %612 = vmatpush.msrb.mxu2 %v577_v13  ;;  %643 = vmatpush.msra.mxu1 %v587_v53 }
  0xf1   :  { %494 = vmatpush.msrb.mxu3 %v407_v26  ;;  %652 = vmatpush.msrb.mxu0 %v578_v15 }
  0xf2   :  { %613 = vmatpush.msrb.mxu2 %v575_v20  ;;  %682 = vmatpush.msrb.mxu1 %v590_v59 }
  0xf3   :  { %653 = vmatpush.msrb.mxu0 %v576_v23 }
  0xf4   :  { %614 = vmatpush.msrb.mxu2 %v573_v24  ;;  %683 = vmatpush.msrb.mxu1 %v588_v62 }
  0xf5   :  { %654 = vmatpush.msrb.mxu0 %v574_v27 }
  0xf6   :  { %475 = vmatmul.f32.vlgmr.msra.gmra.mxu3 %v414_v17  ;;  %615 = vmatpush.msrb.mxu2 %v571_v28 }
  0xf7   :  { %655 = vmatpush.msrb.mxu0 %v572_v29 }
  0xf8   :  { %616 = vmatpush.msrb.mxu2 %v569_v30 }
  0xf9   :  { %656 = vmatpush.msrb.mxu0 %v570_v31  ;;  %v534_v31 = vrot.slane %v1047_v40, 1 }
  0xfa   :  { %617 = vmatpush.msrb.mxu2 %v567_v32 }
  0xfb   :  { %657 = vmatpush.msrb.mxu0 %v568_v33 }
  0xfc   :  { %618 = vmatpush.msrb.mxu2 %v565_v34  ;;  %v542_v34 = vsub.f32 %v1037_v14, %v534_v31 }
  0xfd   :  { %658 = vmatpush.msrb.mxu0 %v566_v35 }
  0xfe   :  { %782 = vmatmul.msk.f32.vlgmr.msrb.gmra.mxu3 %vm99_vm0, %v415_v19  ;;  %619 = vmatpush.msrb.mxu2 %v563_v36  ;;  %v540_v36 = vsub.f32 %v1035_v11, %v1047_v40 }
  0xff   :  { %659 = vmatpush.msrb.mxu0 %v564_v37 }
 0x100   :  { %620 = vmatpush.msrb.mxu2 %v561_v38 }
 0x101   :  { %660 = vmatpush.msrb.mxu0 %v562_v39 }
 0x102   :  { %621 = vmatpush.msrb.mxu2 %v559_v42 }
 0x103   :  { %661 = vmatpush.msrb.mxu0 %v560_v43  ;;  %v591_v43 = vld [vmem:[%s1148_s4] sm:$0x3]  ;;  %s948_s4 = smov [#allocation10]  }
 0x104   :  { %622 = vmatpush.msrb.mxu2 %v557_v44  ;;  %v593_v44 = vperm.slane %v591_v43, 0  ;;  %s762_s13 = sshll.u32 %s948_s4, 4  ;;  %s763_s13 = int_to_ptr.vmem [resolvable:$true] %s762_s13 }
 0x105   :  { %662 = vmatpush.msrb.mxu0 %v558_v45 }
 0x106   :  { %623 = vmatpush.msrb.mxu2 %v555_v46 }
 0x107   :  { %663 = vmatpush.msrb.mxu0 %v556_v47 }
 0x169   :  { %v436_v48 = vpop.f32.mrf.mxu1 }
 0x171   :  { %v456_v49 = vpop.f32.mrf.mxu3 }
 0x172   :  { %v457_v50 = vadd.f32 %v456_v49, %v436_v48  ;;  %v594_v48 = vperm.slane %v591_v43, 1 }
 0x174   :  { %vm499_vm11 = vcmp.le.f32.partialorder %v457_v50, 1e-08 }
 0x175   :  { %v501_v51 = vsel %vm499_vm11, 1.0, %v457_v50 }
 0x176   :  { %802 = vrcp.f32 %v501_v51  ;;  %v514_v1 = vand.u32 2147483648, %v501_v51  ;;  %v512_v25 = vand.u32 2147483647, %v501_v51  ;;  %vm508_vm13 = vweird.f32 %v501_v51 }
 0x178   :  { %v515_v3 = vor.u32 1.1754944e-38, %v514_v1  ;;  %vm513_vm3 = vcmp.eq.f32.partialorder %v512_v25, 8.507059e+37 }
 0x179   :  { %v476_v54 = vpop.f32.mrf.mxu3 }
 0x17c   :  { %v803_v55 = vpop.eup %802 }
 0x17d   :  { %v504_v56 = vmul.f32 %v803_v55, %v501_v51  ;;  %vm509_vm12 = vweird.f32 %v803_v55 }
 0x17e   :  { %vm510_vm14 = vmor %vm508_vm13, %vm509_vm12 }
 0x17f   :  { %v505_v17 = vsub.f32 1.0, %v504_v56 }
 0x181   :  { %v506_v22 = vmul.f32 %v803_v55, %v505_v17  ;;  %v496_v18 = vpop.f32.mrf.mxu3 }
 0x182   :  { %v497_v19 = vadd.f32 %v496_v18, %v476_v54 }
 0x183   :  { %v507_v26 = vadd.f32 %v803_v55, %v506_v22 }
 0x184   :  { %vm500_vm15 = vcmp.le.f32.partialorder %v497_v19, 1e-08 }
 0x185   :  { %v502_v4 = vsel %vm500_vm15, 1.0, %v497_v19  ;;  %v511_v6 = vsel %vm510_vm14, %v803_v55, %v507_v26 }
 0x186   :  { %804 = vrcp.f32 %v502_v4  ;;  %v1105_v7 = vsel %vm513_vm3, %v515_v3, %v511_v6  ;;  %v529_v29 = vand.u32 2147483648, %v502_v4  ;;  %v527_v9 = vand.u32 2147483647, %v502_v4 }
 0x187   :  { %v545_v10 = vrot.slane %v1105_v7, 1  ;;  %v551_v20 = vmul.f32 %v539_v12, %v1105_v7  ;;  %vm523_vm5 = vweird.f32 %v502_v4 }
 0x188   :  { %v530_v5 = vor.u32 1.1754944e-38, %v529_v29  ;;  %vm528_vm7 = vcmp.eq.f32.partialorder %v527_v9, 8.507059e+37 }
 0x189   :  { %v553_v13 = vmul.f32 %v545_v10, %v541_v8 }
 0x18b   :  { %v601_v23 = vrot.slane %v553_v13, 7 }
 0x18c   :  { %v805_v15 = vpop.eup %804 }
 0x18d   :  { %v519_v24 = vmul.f32 %v805_v15, %v502_v4  ;;  %v602_v27 = vsel %vm169_vm1, %v601_v23, %v551_v20  ;;  %vm524_vm4 = vweird.f32 %v805_v15 }
 0x18e   :  { %624 = vmatmul.f32.vlgmr.msrb.gmra.mxu2 %v602_v27  ;;  %664 = vmatmul.f32.vlgmr.msrb.gmra.mxu0 %v602_v27  ;;  %vm525_vm6 = vmor %vm523_vm5, %vm524_vm4 }
 0x18f   :  { %v520_v28 = vsub.f32 1.0, %v519_v24 }
 0x191   :  { %v521_v30 = vmul.f32 %v805_v15, %v520_v28 }
 0x193   :  { %v522_v32 = vadd.f32 %v805_v15, %v521_v30 }
 0x195   :  { %v526_v41 = vsel %vm525_vm6, %v805_v15, %v522_v32 }
 0x196   :  { %v531_v33 = vsel %vm528_vm7, %v530_v5, %v526_v41 }
 0x197   :  { %v546_v35 = vrot.slane %v531_v33, 1  ;;  %v552_v38 = vmul.f32 %v540_v36, %v531_v33 }
 0x199   :  { %v554_v37 = vmul.f32 %v546_v35, %v542_v34 }
 0x19b   :  { %v603_v39 = vrot.slane %v554_v37, 7 }
 0x19d   :  { %v604_v42 = vsel %vm169_vm1, %v603_v39, %v552_v38 }
 0x19e   :  { %783 = vmatmul.msk.f32.vlgmr.msra.gmra.mxu1 %vm99_vm0, %v604_v42 }
 0x1a6   :  { %784 = vmatmul.msk.f32.vlgmr.msrb.gmra.mxu1 %vm99_vm0, %v604_v42 }
 0x20b   :  { %v665_v40 = vpop.f32.mrf.mxu0 }
 0x20c   :  { %v666_v49 = vadd.f32 %v665_v40, %v594_v48 }
 0x211   :  { %v625_v45 = vpop.f32.mrf.mxu2 }
 0x212   :  { %v626_v14 = vadd.f32 %v625_v45, %v593_v44 }
 0x21b   :  { %v645_v46 = vpop.f32.mrf.mxu1 }
 0x21c   :  { %v646_v47 = vadd.f32 %v645_v46, %v626_v14 }
 0x21e   :  { %v785_v11 = vmul.f32 -1.442695, %v646_v47 }
 0x220   :  { %806 = vpow2.f32 %v785_v11 }
 0x223   :  { %v685_v50 = vpop.f32.mrf.mxu1 }
 0x224   :  { %v686_v51 = vadd.f32 %v685_v50, %v666_v49 }
 0x226   :  { %v807_v52 = vpop.eup %806  ;;  %v786_v53 = vmul.f32 -1.442695, %v686_v51 }
 0x227   :  { %v694_v54 = vadd.f32 1.0, %v807_v52 }
 0x228   :  { %808 = vpow2.f32 %v786_v53 }
 0x229   :  { %810 = vrcp.f32 %v694_v54  ;;  %vm701_vm9 = vweird.f32 %v694_v54  ;;  %v707_v26 = vand.u32 2147483648, %v694_v54  ;;  %v705_v3 = vand.u32 2147483647, %v694_v54 }
 0x22b   :  { %v708_v12 = vor.u32 1.1754944e-38, %v707_v26  ;;  %vm706_vm14 = vcmp.eq.f32.partialorder %v705_v3, 8.507059e+37 }
 0x22e   :  { %v809_v55 = vpop.eup %808 }
 0x22f   :  { %v811_v56 = vpop.eup %810  ;;  %v695_v59 = vadd.f32 1.0, %v809_v55 }
 0x230   :  { %v697_v62 = vmul.f32 %v811_v56, %v694_v54  ;;  %vm702_vm8 = vweird.f32 %v811_v56 }
 0x231   :  { %812 = vrcp.f32 %v695_v59  ;;  %v722_v2 = vand.u32 2147483648, %v695_v59  ;;  %v720_v6 = vand.u32 2147483647, %v695_v59  ;;  %vm703_vm11 = vmor %vm701_vm9, %vm702_vm8  ;;  %vm716_vm12 = vweird.f32 %v695_v59 }
 0x232   :  { %v698_v17 = vsub.f32 1.0, %v697_v62 }
 0x233   :  { %v723_v13 = vor.u32 1.1754944e-38, %v722_v2  ;;  %vm721_vm15 = vcmp.eq.f32.partialorder %v720_v6, 8.507059e+37 }
 0x234   :  { %v699_v22 = vmul.f32 %v811_v56, %v698_v17 }
 0x236   :  { %v700_v25 = vadd.f32 %v811_v56, %v699_v22 }
 0x237   :  { %v813_v1 = vpop.eup %812 }
 0x238   :  { %v712_v18 = vmul.f32 %v813_v1, %v695_v59  ;;  %vm717_vm10 = vweird.f32 %v813_v1  ;;  %v704_v8 = vsel %vm703_vm11, %v811_v56, %v700_v25 }
 0x239   :  { %vm718_vm13 = vmor %vm716_vm12, %vm717_vm10  ;;  %v709_v20 = vsel %vm706_vm14, %v708_v12, %v704_v8 }
 0x23a   :  { %v713_v19 = vsub.f32 1.0, %v712_v18  ;;  %v726_v27 = vmul.f32 %v709_v20, %v1105_v7 }
 0x23c   :  { %v714_v4 = vmul.f32 %v813_v1, %v713_v19 }
 0x23e   :  { %v715_v10 = vadd.f32 %v813_v1, %v714_v4 }
 0x240   :  { %v719_v15 = vsel %vm718_vm13, %v813_v1, %v715_v10 }
 0x241   :  { %v724_v23 = vsel %vm721_vm15, %v723_v13, %v719_v15 }
 0x242   :  { %v727_v24 = vmul.f32 %v724_v23, %v531_v33 }
 0x244   :  { %v730_v28 = vrot.slane %v727_v24, 7 }
 0x246   :  { %v731_v29 = vsel %vm258_vm2, %v726_v27, %v730_v28  ;;  %v732_v30 = vsel %vm169_vm1, %v726_v27, %v730_v28 }
 0x247   :  { %v733_v9 = vrot.slane %v732_v30, 1  ;;  %v734_v31 = vperm.slane %v731_v29, 0  ;;  %v735_v32 = vperm.slane %v731_v29, 1 }
 0x249   :  { %v736_v5 = vperm.slane %v733_v9, 0  ;;  %v737_v41 = vperm.slane %v733_v9, 1  ;;  %v742_v34 = vmul.f32 %v734_v31, %v1057_v57  ;;  %v743_v35 = vmul.f32 %v735_v32, %v1060_v58 }
 0x24a   :  { %v744_v36 = vmul.f32 %v734_v31, %v1063_v60  ;;  %v745_v33 = vmul.f32 %v735_v32, %v1066_v61 }
 0x24b   :  { %v746_v7 = vmul.f32 %v736_v5, %v1069_v63  ;;  %750 = vst [vmem:[#allocation10] sm:$0xff] %v742_v34  ;;  %v747_v37 = vmul.f32 %v737_v41, %v1072_v0  ;;  %v748_v38 = vmul.f32 %v736_v5, %v1075_v16  ;;  %v749_v57 = vmul.f32 %v737_v41, %v1078_v21 }
 0x24c   :  { %752 = vst [vmem:[#allocation10 + $0x10] sm:$0xff] %v744_v36 }
 0x24d   :  { %751 = vst.msk [vmem:[#allocation10 + $0x8] sm:$0xff] %vm99_vm0, %v743_v35 }
 0x24e   :  { %753 = vst.msk [vmem:[#allocation10 + $0x18] sm:$0xff] %vm99_vm0, %v745_v33 }
 0x24f   :  { %754 = vst [vmem:[#allocation10 + $0x20] sm:$0xff] %v746_v7 }
 0x250   :  { %755 = vst.msk [vmem:[#allocation10 + $0x28] sm:$0xff] %vm99_vm0, %v747_v37 }
 0x251   :  { %756 = vst [vmem:[#allocation10 + $0x30] sm:$0xff] %v748_v38 }
 0x252   :  { %757 = vst.msk [vmem:[#allocation10 + $0x38] sm:$0xff] %vm99_vm0, %v749_v57 }
 0x253   :  { %770 = dma.vmem_to_hbm [thread:$0]  %s763_s13, 1024, %s765_s16, [#allocation4], %s943_s26, %s943_s26, %s944_s27  }
 0x254   :  { %940 = dma.done.wait [#allocation4], 1024  }
 0x255   :  { %941 = vsyncadd [#allocation4], 4294966272 }
 0x256   :  { %775 = vsyncpa [#allocation3], 1 }
 0x257   :  { %776 = vsyncpa [#allocation6], 1 }
 0x258   :  { %777 = vsyncpa [#allocation9], 1 }
 0x259   :  { %778 = vsyncpa [#allocation4], 1 }

</bundles_post_ra>
